<compile_context>
chip_gen: v7x
topology: tpu7x:2x2x1
jax: 0.10.0
libtpu: 0.0.40
codegen_flags: <defaults>
</compile_context>

<pallas_src>
import functools

import jax
import jax.numpy as jnp
from jax.experimental import pallas as pl
from jax.experimental.pallas import tpu as pltpu


# ---------------------------------------------------------------------------
# Hardware-derived VMEM capacity (v5e/v6e: 128 MiB; v7x: 64 MiB per TC).
# ---------------------------------------------------------------------------
def _vmem_capacity_bytes(default=64 * 1024 * 1024):
    try:
        info = pltpu.get_tpu_info()
        for attr in ("vmem_capacity_bytes", "vmem_size_bytes", "vmem_bytes"):
            cap = getattr(info, attr, None)
            if cap:
                return int(cap)
    except Exception:
        pass
    return default  # conservative (v7x per-TensorCore) fallback


# ---------------------------------------------------------------------------
# Kernel helpers
# ---------------------------------------------------------------------------
def _lane_fold(x, op):
    """Fold (C, k*128) -> (C, 128) with a pairwise tree over lane-aligned
    128-wide slices.  Pure VPU elementwise work; no per-tile XLU cross-lane
    reduction and no long serial accumulation chain."""
    k = x.shape[-1] // 128
    parts = [x[:, i * 128:(i + 1) * 128] for i in range(k)]
    while len(parts) > 1:
        nxt = [op(parts[i], parts[i + 1]) for i in range(0, len(parts) - 1, 2)]
        if len(parts) % 2:
            nxt.append(parts[-1])
        parts = nxt
    return parts[0]


def _mlp_gate(avg, mx, w1t_ref, b1_ref, w2t_ref, b2_ref):
    """Fused 2-layer MLP on the (avg, max) pooled vectors -> sigmoid gate (C,1).

    avg/max are stacked as the two lanes of a single (C, 2) operand so both
    pool types share one pair of MXU matmuls; summing the two result columns
    equals mlp(avg) + mlp(max) with b2 counted twice, exactly like the PyTorch
    loop.  The matmuls run once per image and are hidden under the DMA of the
    next tile/image, so they are deliberately left tiny (no N-dim padding).
    """
    c = avg.shape[0]
    lane = jax.lax.broadcasted_iota(jnp.int32, (c, 2), 1)
    pooled = jnp.where(lane == 0, avg, mx)                              # (C, 2)
    h = jnp.dot(w1t_ref[...], pooled,
                preferred_element_type=jnp.float32) + b1_ref[...]       # (Ch, 2)
    h = jnp.maximum(h, 0.0)                                             # ReLU
    att = jnp.dot(w2t_ref[...], h,
                  preferred_element_type=jnp.float32) + b2_ref[...]     # (C, 2)
    att_sum = jnp.sum(att, axis=-1, keepdims=True)                      # (C, 1)
    return jax.nn.sigmoid(att_sum)


# ---------------------------------------------------------------------------
# Path 1: single-pass, VMEM-resident (2 HBM passes)
# ---------------------------------------------------------------------------
def _channel_gate_resident_kernel(x_ref, w1t_ref, b1_ref, w2t_ref, b2_ref,
                                  o_ref, *, inv_hw):
    # x_ref block: (1, C, HW) -- the whole image is VMEM-resident.
    x = x_ref[0]
    xf = x.astype(jnp.float32)
    avg = jnp.sum(xf, axis=-1, keepdims=True) * inv_hw                  # (C, 1)
    mx = jnp.max(xf, axis=-1, keepdims=True)                            # (C, 1)
    scale = _mlp_gate(avg, mx, w1t_ref, b1_ref, w2t_ref, b2_ref)        # (C, 1)
    o_ref[0] = (x * scale).astype(o_ref.dtype)


# ---------------------------------------------------------------------------
# Path 2: two-phase tiled (3 HBM passes), for maps too large to keep resident
# ---------------------------------------------------------------------------
def _channel_gate_tiled_kernel(x_ref, w1t_ref, b1_ref, w2t_ref, b2_ref, o_ref,
                               sum_acc, max_acc, scale_acc, *, inv_hw, rem):
    # Grid (B, 2 phases, n_t spatial tiles), t fastest.
    phase = pl.program_id(1)
    t = pl.program_id(2)
    n_t = pl.num_programs(2)
    hw_tile = x_ref.shape[-1]

    @pl.when(phase == 0)
    def _pool_and_gate():
        x = x_ref[0].astype(jnp.float32)                                # (C, hw_tile)

        if rem:
            # Ragged last tile: lanes >= rem of the padded block hold
            # unspecified data -- mask them out of the pools.
            lane = jax.lax.broadcasted_iota(jnp.int32, x.shape, 1)
            valid = jnp.logical_or(t != n_t - 1, lane < rem)
            x_sum_in = jnp.where(valid, x, 0.0)
            x_max_in = jnp.where(valid, x, -jnp.inf)
        else:
            x_sum_in = x
            x_max_in = x

        @pl.when(t == 0)
        def _init():
            sum_acc[...] = jnp.zeros_like(sum_acc)
            max_acc[...] = jnp.full(max_acc.shape, -jnp.inf, dtype=max_acc.dtype)

        if hw_tile % 128 == 0:
            # 128-lane-wide accumulators: per-tile work is pure VPU add/max;
            # the single cross-lane (XLU) reduction happens once, in _gate.
            sum_acc[...] = sum_acc[...] + _lane_fold(x_sum_in, jnp.add)
            max_acc[...] = jnp.maximum(max_acc[...],
                                       _lane_fold(x_max_in, jnp.maximum))
        else:
            # Single full-extent tile whose width is not a 128 multiple.
            sum_acc[:, 0:1] = sum_acc[:, 0:1] + jnp.sum(x_sum_in, axis=-1,
                                                        keepdims=True)
            max_acc[:, 0:1] = jnp.maximum(
                max_acc[:, 0:1], jnp.max(x_max_in, axis=-1, keepdims=True))

        @pl.when(t == n_t - 1)
        def _gate():
            avg = jnp.sum(sum_acc[...], axis=-1, keepdims=True) * inv_hw
            mx = jnp.max(max_acc[...], axis=-1, keepdims=True)
            scale_acc[...] = _mlp_gate(avg, mx, w1t_ref, b1_ref, w2t_ref, b2_ref)

    @pl.when(phase == 1)
    def _apply():
        # Second read of the tile; the (C, 1) gate broadcasts across lanes.
        o_ref[0] = (x_ref[0] * scale_acc[...]).astype(o_ref.dtype)


def _pick_hw_tile(hw, c, itemsize, budget_bytes, min_tile_bytes=2 * 1024 * 1024):
    """Spatial tile for the two-phase path, sized in bytes per grid step.

    Floor ~2 MiB (keeps the ~0.35us per-step overhead small even at v7x's
    ~3.2 TB/s), capped so double-buffered input/output tiles plus f32
    temporaries fit the planning budget, and -- where possible -- a 128
    multiple that divides HW so there is no ragged tail.
    """
    per_lane = c * (4 * itemsize + 3 * 4)   # 2x(in+out) buffers + ~3 f32 temps
    cap = max(128, (budget_bytes // per_lane) // 128 * 128)
    if cap >= hw:
        return hw                            # single full-extent spatial block
    floor = -(-min_tile_bytes // (c * itemsize))
    floor = -(-floor // 128) * 128
    floor = max(128, min(floor, cap))
    tile = cap
    cand = cap
    while cand >= floor:
        if hw % cand == 0:
            tile = cand
            break
        cand -= 128
    return tile


# ---------------------------------------------------------------------------
# Wrapper
# ---------------------------------------------------------------------------
def channel_gate(x, w1, b1, w2, b2, *, hw_tile=None, force_tiled=False,
                 vmem_budget_bytes=None):
    """CBAM ChannelGate forward (pool_types=['avg', 'max']).

    x:  (B, C, H, W), f32 or bf16 (NCHW, consumed directly -- no transposes).
    w1: (C, Ch), b1: (Ch,)   -- first nn.Linear, stored as (in, out).
    w2: (Ch, C), b2: (C,)    -- second nn.Linear, stored as (in, out).
    """
    B, C, H, W = x.shape
    HW = H * W
    hidden = w1.shape[1]
    itemsize = jnp.dtype(x.dtype).itemsize

    # Free reshapes only; tiny weight transposes so the MLP runs column-major.
    x3 = x.reshape(B, C, HW)
    w1t = jnp.transpose(w1).astype(jnp.float32)          # (Ch, C)
    w2t = jnp.transpose(w2).astype(jnp.float32)          # (C, Ch)
    b1c = b1.reshape(hidden, 1).astype(jnp.float32)
    b2c = b2.reshape(C, 1).astype(jnp.float32)

    # Chip-derived VMEM numbers: planning budget (residency + tile cap) and the
    # compiler's scoped-VMEM limit.  v7x has 64 MiB per TC vs 128 MiB on
    # v5e/v6e, so never hard-code these.
    capacity = _vmem_capacity_bytes()
    if vmem_budget_bytes is None:
        vmem_budget_bytes = int(0.60 * capacity)
    vmem_limit_bytes = int(0.85 * capacity)

    image_bytes = C * HW * itemsize
    # Resident if double-buffered (in + out) tiles plus f32 temporaries fit.
    resident = (hw_tile is None and not force_tiled
                and 4 * image_bytes + 8 * C * HW <= vmem_budget_bytes)

    cost = pl.CostEstimate(
        flops=int(B * C * HW + 8 * B * C * hidden),
        transcendentals=int(B * C),
        bytes_accessed=int((2 if resident else 3) * B * image_bytes),
    )
    params = pltpu.CompilerParams(
        dimension_semantics=(("parallel",) if resident
                             else ("parallel", "arbitrary", "arbitrary")),
        vmem_limit_bytes=vmem_limit_bytes,
    )
    # TODO(synk): on v7x a B==1 call only feeds one of the two TensorCores; a
    # core-split over the HW axis (partial pools combined via VMEM_SHARED +
    # core_barrier) would recover the idle core for single-image inference.

    if resident:
        out3 = pl.pallas_call(
            functools.partial(_channel_gate_resident_kernel, inv_hw=1.0 / HW),
            out_shape=jax.ShapeDtypeStruct((B, C, HW), x.dtype),
            grid_spec=pltpu.PrefetchScalarGridSpec(
                num_scalar_prefetch=0,
                grid=(B,),
                in_specs=[
                    pl.BlockSpec((1, C, HW), lambda b: (b, 0, 0)),
                    pl.BlockSpec((hidden, C), lambda b: (0, 0)),
                    pl.BlockSpec((hidden, 1), lambda b: (0, 0)),
                    pl.BlockSpec((C, hidden), lambda b: (0, 0)),
                    pl.BlockSpec((C, 1), lambda b: (0, 0)),
                ],
                out_specs=pl.BlockSpec((1, C, HW), lambda b: (b, 0, 0)),
            ),
            compiler_params=params,
            cost_estimate=cost,
        )(x3, w1t, b1c, w2t, b2c)
        return out3.reshape(B, C, H, W)

    # ---- two-phase tiled path ----
    if hw_tile is None:
        hw_tile = _pick_hw_tile(HW, C, itemsize, vmem_budget_bytes)
    hw_tile = min(hw_tile, HW)
    assert hw_tile == HW or hw_tile % 128 == 0, (
        "hw_tile must be a multiple of 128 or the full spatial extent")

    n_t = pl.cdiv(HW, hw_tile)
    rem = HW - (n_t - 1) * hw_tile
    if rem == hw_tile:
        rem = 0

    # Grid order is load-bearing: batch is axis 0, phase is axis 1, spatial
    # tile is axis 2 (innermost).  The out_specs index_map (b, 0, t*p) pins the
    # output block to tile 0 during the (write-free) pooling phase; this is
    # only safe because the very next grid step after phase 0 is phase 1 with
    # t == 0, which writes that block before its index ever changes.  Do NOT
    # reorder grid axes or move `phase` innermost.
    grid = (B, 2, n_t)

    out3 = pl.pallas_call(
        functools.partial(_channel_gate_tiled_kernel, inv_hw=1.0 / HW, rem=rem),
        out_shape=jax.ShapeDtypeStruct((B, C, HW), x.dtype),
        grid_spec=pltpu.PrefetchScalarGridSpec(
            num_scalar_prefetch=0,
            grid=grid,
            in_specs=[
                pl.BlockSpec((1, C, hw_tile), lambda b, p, t: (b, 0, t)),
                pl.BlockSpec((hidden, C), lambda b, p, t: (0, 0)),
                pl.BlockSpec((hidden, 1), lambda b, p, t: (0, 0)),
                pl.BlockSpec((C, hidden), lambda b, p, t: (0, 0)),
                pl.BlockSpec((C, 1), lambda b, p, t: (0, 0)),
            ],
            out_specs=pl.BlockSpec((1, C, hw_tile),
                                   lambda b, p, t: (b, 0, t * p)),
            scratch_shapes=[
                pltpu.VMEM((C, 128), jnp.float32),   # running sum (lane-wide)
                pltpu.VMEM((C, 128), jnp.float32),   # running max (lane-wide)
                pltpu.VMEM((C, 1), jnp.float32),     # sigmoid gate
            ],
        ),
        compiler_params=params,
        cost_estimate=cost,
    )(x3, w1t, b1c, w2t, b2c)
    return out3.reshape(B, C, H, W)


# ---------------------------------------------------------------------------
# Pure-JAX reference matching the PyTorch forward (pool_types=['avg','max'])
# ---------------------------------------------------------------------------
def channel_gate_reference(x, w1, b1, w2, b2):
    B, C, H, W = x.shape
    flat = x.reshape(B, C, H * W).astype(jnp.float32)
    avg = jnp.mean(flat, axis=2)          # (B, C)
    mx = jnp.max(flat, axis=2)            # (B, C)

    def mlp(p):
        h = jnp.maximum(p @ w1 + b1, 0.0)
        return h @ w2 + b2

    att = mlp(avg) + mlp(mx)                          # (B, C)
    scale = jax.nn.sigmoid(att)[:, :, None, None]     # (B, C, 1, 1)
    return x.astype(jnp.float32) * scale


if __name__ == "__main__":
    # gate_channels=128, reduction_ratio=16 (module defaults) -> hidden=8
    B, C, H, W = 2, 128, 16, 16
    hidden = C // 16

    key = jax.random.PRNGKey(0)
    kx, kx2, k1, k2, k3, k4 = jax.random.split(key, 6)

    x = jax.random.normal(kx, (B, C, H, W), dtype=jnp.float32)
    # Synthetic params (nn.Linear weights stored here as (in, out)).
    w1 = jax.random.normal(k1, (C, hidden), dtype=jnp.float32) * 0.1
    b1 = jax.random.normal(k2, (hidden,), dtype=jnp.float32) * 0.1
    w2 = jax.random.normal(k3, (hidden, C), dtype=jnp.float32) * 0.1
    b2 = jax.random.normal(k4, (C,), dtype=jnp.float32) * 0.1

    y_ref = channel_gate_reference(x, w1, b1, w2, b2)

    # 1) Single-pass VMEM-resident path (default for small maps): 2 HBM passes.
    y_res = jax.block_until_ready(channel_gate(x, w1, b1, w2, b2))
    assert y_res.shape == (B, C, H, W)
    assert jnp.allclose(y_res, y_ref, atol=1e-5, rtol=1e-5), "mismatch (resident)"

    # 2) Two-phase tiled path, auto tile (single full-extent spatial block).
    y_t1 = jax.block_until_ready(channel_gate(x, w1, b1, w2, b2, force_tiled=True))
    assert jnp.allclose(y_t1, y_ref, atol=1e-5, rtol=1e-5), "mismatch (tiled auto)"

    # 3) Two-phase tiled path with cross-tile accumulation (2 x 128-lane tiles).
    y_t2 = jax.block_until_ready(channel_gate(x, w1, b1, w2, b2, hw_tile=128))
    assert jnp.allclose(y_t2, y_ref, atol=1e-5, rtol=1e-5), "mismatch (tiled 128)"

    # 4) Ragged spatial extent: HW=324 is not a multiple of the 256-lane tile
    #    (exercises the cdiv grid + masked-tail pooling).
    H2 = W2 = 18
    xr = jax.random.normal(kx2, (B, C, H2, W2), dtype=jnp.float32)
    yr_ref = channel_gate_reference(xr, w1, b1, w2, b2)
    yr = jax.block_until_ready(channel_gate(xr, w1, b1, w2, b2, hw_tile=256))
    assert jnp.allclose(yr, yr_ref, atol=1e-5, rtol=1e-5), "mismatch (ragged)"

    # 5) bf16 activations (halves HBM traffic on this bandwidth-bound op).
    xb = x.astype(jnp.bfloat16)
    yb_ref = channel_gate_reference(xb, w1, b1, w2, b2)
    yb = jax.block_until_ready(channel_gate(xb, w1, b1, w2, b2))
    assert yb.dtype == jnp.bfloat16
    assert jnp.allclose(yb.astype(jnp.float32), yb_ref, atol=3e-2, rtol=3e-2), \
        "mismatch (bf16)"

    print("KERNEL_OK")
</pallas_src>

<mosaic_0001>
module attributes {stable_mosaic.version = 11 : i64} {
  func.func @_channel_gate_resident_kernel(%arg0: i32, %arg1: memref<1x128x256xf32, #tpu.memory_space<vmem>>, %arg2: memref<8x128xf32, #tpu.memory_space<vmem>>, %arg3: memref<8x1xf32, #tpu.memory_space<vmem>>, %arg4: memref<128x8xf32, #tpu.memory_space<vmem>>, %arg5: memref<128x1xf32, #tpu.memory_space<vmem>>, %arg6: memref<1x128x256xf32, #tpu.memory_space<vmem>>) attributes {dimension_semantics = [#tpu.dimension_semantics<parallel>], iteration_bounds = array<i64: 2>, scalar_prefetch = 0 : i64, scratch_operands = 0 : i64, tpu.core_type = #tpu.core_type<tc>, window_params = [{transform_indices = @transform_0, window_bounds = array<i64: 1, 128, 256>}, {pipeline_mode = #tpu.pipeline_mode<synchronous>, transform_indices = @transform_1, window_bounds = array<i64: 8, 128>}, {pipeline_mode = #tpu.pipeline_mode<synchronous>, transform_indices = @transform_2, window_bounds = array<i64: 8, 1>}, {pipeline_mode = #tpu.pipeline_mode<synchronous>, transform_indices = @transform_3, window_bounds = array<i64: 128, 8>}, {pipeline_mode = #tpu.pipeline_mode<synchronous>, transform_indices = @transform_4, window_bounds = array<i64: 128, 1>}, {transform_indices = @transform_5, window_bounds = array<i64: 1, 128, 256>}]} {
    %c0 = arith.constant 0 : index
    %c0_0 = arith.constant 0 : index
    %c0_1 = arith.constant 0 : index
    %0 = vector.load %arg1[%c0, %c0_0, %c0_1] : memref<1x128x256xf32, #tpu.memory_space<vmem>>, vector<1x128x256xf32>
    %1 = vector.shape_cast %0 : vector<1x128x256xf32> to vector<128x256xf32>
    %cst = arith.constant dense<0.000000e+00> : vector<128xf32>
    %2 = vector.multi_reduction <add>, %1, %cst [1] : vector<128x256xf32> to vector<128xf32>
    %3 = vector.shape_cast %2 : vector<128xf32> to vector<128x1xf32>
    %cst_2 = arith.constant 3.906250e-03 : f32
    %4 = vector.broadcast %cst_2 : f32 to vector<128x1xf32>
    %5 = arith.mulf %3, %4 : vector<128x1xf32>
    %cst_3 = arith.constant dense<0xFF800000> : vector<128xf32>
    %6 = vector.multi_reduction <maximumf>, %1, %cst_3 [1] : vector<128x256xf32> to vector<128xf32>
    %7 = vector.shape_cast %6 : vector<128xf32> to vector<128x1xf32>
    %8 = tpu.iota {dimensions = array<i32: 1>} : vector<128x2xi32>
    %c0_i32 = arith.constant 0 : i32
    %9 = vector.broadcast %c0_i32 : i32 to vector<128x2xi32>
    %10 = arith.cmpi eq, %8, %9 : vector<128x2xi32>
    %11 = vector.shape_cast %5 : vector<128x1xf32> to vector<128x1xf32>
    %12 = vector.broadcast %11 : vector<128x1xf32> to vector<128x2xf32>
    %13 = vector.shape_cast %7 : vector<128x1xf32> to vector<128x1xf32>
    %14 = vector.broadcast %13 : vector<128x1xf32> to vector<128x2xf32>
    %15 = arith.select %10, %12, %14 : vector<128x2xi1>, vector<128x2xf32>
    %c0_4 = arith.constant 0 : index
    %c0_5 = arith.constant 0 : index
    %16 = vector.load %arg2[%c0_4, %c0_5] : memref<8x128xf32, #tpu.memory_space<vmem>>, vector<8x128xf32>
    %cst_6 = arith.constant dense<0.000000e+00> : vector<8x2xf32>
    %17 = tpu.matmul %16, %15, %cst_6 {dimension_numbers = #tpu.dot_dimension_numbers<[1], [0], [0], [1], [0, 0, 1, 1], [], []>} : vector<8x128xf32>, vector<128x2xf32>, vector<8x2xf32> -> vector<8x2xf32>
    %c0_7 = arith.constant 0 : index
    %c0_8 = arith.constant 0 : index
    %18 = vector.load %arg3[%c0_7, %c0_8] : memref<8x1xf32, #tpu.memory_space<vmem>>, vector<8x1xf32>
    %19 = vector.broadcast %18 : vector<8x1xf32> to vector<8x2xf32>
    %20 = arith.addf %17, %19 : vector<8x2xf32>
    %cst_9 = arith.constant 0.000000e+00 : f32
    %21 = vector.broadcast %cst_9 : f32 to vector<8x2xf32>
    %22 = arith.maximumf %20, %21 : vector<8x2xf32>
    %c0_10 = arith.constant 0 : index
    %c0_11 = arith.constant 0 : index
    %23 = vector.load %arg4[%c0_10, %c0_11] : memref<128x8xf32, #tpu.memory_space<vmem>>, vector<128x8xf32>
    %cst_12 = arith.constant dense<0.000000e+00> : vector<128x2xf32>
    %24 = tpu.matmul %23, %22, %cst_12 {dimension_numbers = #tpu.dot_dimension_numbers<[1], [0], [0], [1], [0, 0, 1, 1], [], []>} : vector<128x8xf32>, vector<8x2xf32>, vector<128x2xf32> -> vector<128x2xf32>
    %c0_13 = arith.constant 0 : index
    %c0_14 = arith.constant 0 : index
    %25 = vector.load %arg5[%c0_13, %c0_14] : memref<128x1xf32, #tpu.memory_space<vmem>>, vector<128x1xf32>
    %26 = vector.broadcast %25 : vector<128x1xf32> to vector<128x2xf32>
    %27 = arith.addf %24, %26 : vector<128x2xf32>
    %cst_15 = arith.constant dense<0.000000e+00> : vector<128xf32>
    %28 = vector.multi_reduction <add>, %27, %cst_15 [1] : vector<128x2xf32> to vector<128xf32>
    %29 = vector.shape_cast %28 : vector<128xf32> to vector<128x1xf32>
    %30 = arith.negf %29 : vector<128x1xf32>
    %31 = math.exp %30 : vector<128x1xf32>
    %cst_16 = arith.constant 1.000000e+00 : f32
    %32 = vector.broadcast %cst_16 : f32 to vector<128x1xf32>
    %33 = arith.addf %32, %31 : vector<128x1xf32>
    %34 = arith.divf %32, %33 : vector<128x1xf32>
    %35 = vector.broadcast %34 : vector<128x1xf32> to vector<128x256xf32>
    %36 = arith.mulf %1, %35 : vector<128x256xf32>
    %c0_17 = arith.constant 0 : index
    %c0_18 = arith.constant 0 : index
    %c0_19 = arith.constant 0 : index
    %37 = vector.load %arg6[%c0_17, %c0_18, %c0_19] : memref<1x128x256xf32, #tpu.memory_space<vmem>>, vector<1x128x256xf32>
    %38 = vector.shape_cast %37 : vector<1x128x256xf32> to vector<128x256xf32>
    %39 = vector.shape_cast %36 : vector<128x256xf32> to vector<1x128x256xf32>
    tpu.vector_store %arg6[%c0_17, %c0_18, %c0_19], %39 {strides = array<i32>} : memref<1x128x256xf32, #tpu.memory_space<vmem>>, vector<1x128x256xf32>,
    return
  }
  func.func @transform_0(%arg0: i32) -> (i32, i32, i32) {
    %c0_i32 = arith.constant 0 : i32
    %c0_i32_0 = arith.constant 0 : i32
    %c0_i32_1 = arith.constant 0 : i32
    return %arg0, %c0_i32, %c0_i32_0 : i32, i32, i32
  }
  func.func @transform_1(%arg0: i32) -> (i32, i32) {
    %c0_i32 = arith.constant 0 : i32
    %c0_i32_0 = arith.constant 0 : i32
    %c0_i32_1 = arith.constant 0 : i32
    return %c0_i32, %c0_i32_0 : i32, i32
  }
  func.func @transform_2(%arg0: i32) -> (i32, i32) {
    %c0_i32 = arith.constant 0 : i32
    %c0_i32_0 = arith.constant 0 : i32
    %c0_i32_1 = arith.constant 0 : i32
    return %c0_i32, %c0_i32_0 : i32, i32
  }
  func.func @transform_3(%arg0: i32) -> (i32, i32) {
    %c0_i32 = arith.constant 0 : i32
    %c0_i32_0 = arith.constant 0 : i32
    %c0_i32_1 = arith.constant 0 : i32
    return %c0_i32, %c0_i32_0 : i32, i32
  }
  func.func @transform_4(%arg0: i32) -> (i32, i32) {
    %c0_i32 = arith.constant 0 : i32
    %c0_i32_0 = arith.constant 0 : i32
    %c0_i32_1 = arith.constant 0 : i32
    return %c0_i32, %c0_i32_0 : i32, i32
  }
  func.func @transform_5(%arg0: i32) -> (i32, i32, i32) {
    %c0_i32 = arith.constant 0 : i32
    %c0_i32_0 = arith.constant 0 : i32
    %c0_i32_1 = arith.constant 0 : i32
    return %arg0, %c0_i32, %c0_i32_0 : i32, i32, i32
  }
}

</mosaic_0001>

<bundles_post_ra>
// kernel: tpu_custom_call.1
= control target key start
LH: loop header
LB: loop body
LE: loop exit
PB: predicated region body
PF: predicated region fallthrough
CT: control target
= control target key end

     0   :  { %10 = vsyncpa [#allocation3], 0  ;;  %s2083_s0 = inlined_call_operand.hbm [shape: f32[2,128,256], index: 0, kind: input, shape index: {}]   ;;  %s2084_s1 = inlined_call_operand.vmem [shape: f32[8,128], index: 1, kind: input, shape index: {}]   ;;  %s2085_s2 = inlined_call_operand.vmem [shape: f32[8,1], index: 2, kind: input, shape index: {}]   ;;  %s2086_s3 = inlined_call_operand.vmem [shape: f32[128,8], index: 3, kind: input, shape index: {}]   ;;  %s2087_s4 = inlined_call_operand.vmem [shape: f32[128,1], index: 4, kind: input, shape index: {}]   ;;  %s2088_s5 = inlined_call_operand.hbm [shape: f32[2,128,256], index: 5, kind: output, shape index: {}]  }
   0x1   :  { %12 = vsyncpa [#allocation3 + $0x1], 0 }
   0x2   :  { %13 = vsyncpa [#allocation4], 0 }
   0x3   :  { %15 = vsyncpa [#allocation4 + $0x1], 0  ;;  %s1511_s18 = smov 0   ;;  %s1513_s19 = smov 0  }
   0x4   :  { %s1515_s20 = smov 0   ;;  %s1517_s21 = smov 0  }
   0x5 LB: > { %s1532_s22 = sadd.s32 4294967295, %s1469_s21   ;;  %s1086_s23 = sadd.s32 4294967294, %s1469_s21   ;;  %s1469_s21 = sphi %s1517_s21, %s2101_s21   ;;  %s1465_s20 = sphi %s1515_s20, %s2100_s20   ;;  %s1461_s19 = sphi %s1513_s19, %s2099_s19   ;;  %s1457_s18 = sphi %s1511_s18, %s2098_s18  }
   0x6   : > { %s1536_s24 = sadd.s32 1, %s1469_s21   ;;  %s28_s25 = sadd.s32 1, %s1465_s20 }
   0x7   : > { %s25_s26 = ssub.s32 %s1469_s21, %s1536_s24  ;;  %p35_p0 = scmp.ne.s32.totalorder %s1465_s20, %s1461_s19 }
   0x8   : > { %p26_p1 = scmp.eq.s32.totalorder %s25_s26, 0  ;;  %p36_p2 = scmp.eq.s32.totalorder %s1469_s21, 0 }
   0x9   : > { %p41_p3 = scmp.ne.s32.totalorder %s1461_s19, %s1457_s18  ;;  %p42_p4 = scmp.eq.s32.totalorder %s1532_s22, 0 }
   0xa   : > { %s1548_s27 = scalar_select %p26_p1, %s1465_s20, %s28_s25  }
   0xb   : > { %p1550_p5 = por %p36_p2, %p35_p0  ;;  %p1554_p6 = por %p42_p4, %p41_p3 }
   0xc   : > { %p149_p7 = scmp.eq.s32.totalorder %s1532_s22, 1  ;;  %p155_p8 = scmp.eq.s32.totalorder %s1086_s23, 1 }
   0xd   : > { %p1265_p10 = scmp.lt.s32.totalorder %s1469_s21, 2  ;;  %s187_s7 = sand.u32 1, %s1465_s20  }
   0xe   : > { %p1561_p11 = por %p149_p7, %p35_p0  ;;  %p1565_p12 = por %p155_p8, %p41_p3 }
   0xf   : > { %s1132_s8 = sshll.u32 %s1469_s21, 12  ;;  %s1089_s9 = sshll.u32 %s187_s7, 8 }
  0x10   : > { %s2092_s30 = scalar_select %p1561_p11, 1, 0 }
  0x11   : > { %s2093_s6 = scalar_select %p1565_p12, 1, 0 }
  0x12   : > { %s1574_s12 = scalar_lea.hbm %s2083_s0, %s1132_s8  ;;  %s191_s13 = scalar_lea.vmem [#allocation2], %s1089_s9 }
  0x13   : > { %s198_s14 = sshll.u32 %s191_s13, 4  ;;  %p1578_p13 = pnand %p1265_p10, %p1550_p5  ;;  %s1582_s14 = int_to_ptr.vmem [resolvable:$true] %s198_s14 }
  0x14   : > { %s1584_s16 = scalar_lea.sflag [#allocation3], %s187_s7  ;;  %s1373_s17 = scalar_lea.hbm %s1574_s12, 4096 }
  0x15   : > { %p1374_p0 = scmp.ne.s32.totalorder %s1574_s12, %s1373_s17  ;;  %p1375_p1 = pneg %p1578_p13 }
  0x16   : > { %s1378_s26 = scalar_lea.hbm %s2083_s0, 8192  ;;  %p1379_p4 = scmp.lt.u32.totalorder %s1574_s12, %s2083_s0 }
  0x17   : > { %p1376_p2 = pnand %p1375_p1, %p1374_p0  ;;  %p1380_p5 = scmp.lt.u32.totalorder %s1378_s26, %s1373_s17 }
  0x18   : > { %p1382_p8 = scmp.lt.u32.totalorder %s1373_s17, %s1574_s12 }
  0x19   : > { %p1377_p3 = pneg %p1376_p2  ;;  %p1381_p7 = por %p1380_p5, %p1379_p4 }
  0x1b   : > { %p1383_p10 = por %p1382_p8, %p1381_p7 }
  0x1d   : > { %p1384_p9 = pnand %p1383_p10, %p1377_p3 }
  0x1f   : > { %1387 = shalt.err (!%p1384_p9)
}
  0x20   : > { %s1388_s7 = scalar_lea.vmem %s1582_s14, 4096  ;;  %s1471_s9 = smov [#allocation2]  }
  0x21   : > { %p1389_p0 = scmp.ne.s32.totalorder %s1582_s14, %s1388_s7  ;;  %s1393_s10 = sshll.u32 %s1471_s9, 4  ;;  %s1394_s10 = int_to_ptr.vmem [resolvable:$false] %s1393_s10 }
  0x22   : > { %s1395_s11 = scalar_lea.vmem %s1394_s10, 8192  ;;  %p1396_p11 = scmp.lt.s32.totalorder %s1582_s14, %s1394_s10 }
  0x23   : > { %p1391_p2 = pnand %p1389_p0, %p1375_p1  ;;  %p1397_p4 = scmp.lt.s32.totalorder %s1395_s11, %s1388_s7 }
  0x25   : > { %p1392_p12 = pneg %p1391_p2  ;;  %p1398_p5 = por %p1397_p4, %p1396_p11 }
  0x27   : > { %p1399_p7 = pnand %p1398_p5, %p1392_p12 }
  0x29   : > { %1402 = shalt.err (!%p1399_p7)
}
  0x2a   : > { %s1472_s13 = smov 256   ;;  %s1473_s17 = smov 16  }
  0x2b   : > { %1260 = dma.hbm_to_vmem [thread:$0]  (!%p1578_p13), %s1574_s12, 4096, %s1582_s14, %s1584_s16, %s1472_s13, %s1472_s13, %s1473_s17  }
  0x2c   : > { %p1092_p9 = scmp.ge.s32.totalorder %s1469_s21, 1  ;;  %p206_p1 = scmp.lt.s32.totalorder %s1469_s21, 3 }
  0x2e   : > { %p207_p3 = pnand %p1092_p9, %p206_p1 }
  0x2f   : > { %s1615_s23 = sand.u32 (!%p207_p3), 1, %s1461_s19  }
  0x30   : > { %210 = sbr.rel (%p207_p3) target bundleno = 920 (0x398), region = 40  ;;  %s1093_s25 = sshll.u32 (!%p207_p3), %s1615_s23, 8 }
  0x31   : > { %s213_s26 = scalar_lea.sflag (!%p207_p3), [#allocation3], %s1615_s23  ;;  %s1621_s28 = scalar_lea.vmem (!%p207_p3), [#allocation2], %s1093_s25 }
  0x37   : > { %1448 = dma.done.wait (%p1554_p6), %s213_s26, 4096  }
  0x38   : > { %1450 = vsyncadd (%p1554_p6), %s213_s26, 4294963200  ;;  %v1628_v0 = vld [vmem:[%s1621_s28] sm:$0xff]  ;;  %v1631_v1 = vld [vmem:[%s1621_s28 + $0x8] sm:$0xff]  ;;  %v1474_v30 = vmov 0.0|0.0   ;;  %vm1475_vm0 = vmmov 0   ;;  %vm596_vm2 = vcmask 64512  }
  0x39   : > { %v1634_v2 = vld [vmem:[%s1621_s28 + $0x10] sm:$0xff]  ;;  %v339_v3 = vmax.f32 %v1628_v0, %v1631_v1  ;;  %v275_v4 = vadd.f32 %v1631_v1, %v1628_v0  ;;  %v1641_v5 = vld [vmem:[%s1621_s28 + $0x18] sm:$0xff]  ;;  %v1654_v10 = vld [vmem:[%s1621_s28 + $0x20] sm:$0xff]  ;;  %1229 = vmatprep.subr.bf16.mxu0 %v1474_v30  ;;  %vm790_vm3 = vcmask 15360   ;;  %s1970_s26 = scalar_lea.vmem [#allocation5], %s1093_s25  ;;  %s1133_s25 = sshll.u32 %s1532_s22, 12 }
  0x3a   : > { %v342_v6 = vmax.f32 %v1634_v2, %v1641_v5  ;;  %v278_v7 = vadd.f32 %v1641_v5, %v1634_v2  ;;  %v1648_v8 = vld [vmem:[%s1621_s28 + $0x30] sm:$0xff]  ;;  %v1651_v9 = vld [vmem:[%s1621_s28 + $0x38] sm:$0xff]  ;;  %v1657_v11 = vld [vmem:[%s1621_s28 + $0x28] sm:$0xff]  ;;  %s2031_s14 = scalar_lea.hbm %s2088_s5, %s1133_s25  ;;  %s1000_s22 = scalar_lea.sflag [#allocation4], %s1615_s23 }
  0x3b   : > { %340 = vmax.xlane.f32.xlu1 %v339_v3  ;;  %276 = vadd.xlane.f32.xlu0 %v275_v4  ;;  %v284_v12 = vadd.f32 %v1651_v9, %v1648_v8  ;;  %v281_v13 = vadd.f32 %v1657_v11, %v1654_v10  ;;  %v348_v14 = vmax.f32 %v1648_v8, %v1651_v9  ;;  %v1668_v16 = vld [vmem:[%s1621_s28 + $0x50] sm:$0xff]  ;;  %v1671_v17 = vld [vmem:[%s1621_s28 + $0x58] sm:$0xff]  ;;  %v1674_v18 = vld [vmem:[%s1621_s28 + $0x40] sm:$0xff]  ;;  %v1476_v4 = vmov 0.0   ;;  %p2095_p11 = scmp.ne.s32.totalorder %s2092_s30, 0  ;;  %s1478_s16 = smov [#allocation5]  }
  0x3c   : > { %v345_v15 = vmax.f32 %v1654_v10, %v1657_v11  ;;  %v1677_v19 = vld [vmem:[%s1621_s28 + $0x48] sm:$0xff]  ;;  %v290_v20 = vadd.f32 %v1671_v17, %v1668_v16  ;;  %v354_v22 = vmax.f32 %v1668_v16, %v1671_v17  ;;  %v1688_v24 = vld [vmem:[%s1621_s28 + $0x70] sm:$0xff]  ;;  %v1691_v25 = vld [vmem:[%s1621_s28 + $0x78] sm:$0xff]  ;;  %1200 = vmatprep.mubr.msk.f32.mxu0 %vm1475_vm0, %v1476_v4  ;;  %s1407_s8 = sshll.u32 %s1478_s16, 4  ;;  %s1408_s8 = int_to_ptr.vmem [resolvable:$false] %s1407_s8 }
  0x3d   : > { %v287_v21 = vadd.f32 %v1677_v19, %v1674_v18  ;;  %v351_v23 = vmax.f32 %v1674_v18, %v1677_v19  ;;  %v1694_v26 = vld [vmem:[%s1621_s28 + $0x60] sm:$0xff]  ;;  %v1697_v27 = vld [vmem:[%s1621_s28 + $0x68] sm:$0xff]  ;;  %v296_v28 = vadd.f32 %v1691_v25, %v1688_v24  ;;  %v360_v31 = vmax.f32 %v1688_v24, %v1691_v25  ;;  %v1709_v33 = vld [vmem:[%s1621_s28 + $0x90] sm:$0xff]  ;;  %s1409_s7 = scalar_lea.vmem %s1408_s8, 8192 }
  0x3e   : > { %v293_v29 = vadd.f32 %v1697_v27, %v1694_v26  ;;  %v357_v32 = vmax.f32 %v1694_v26, %v1697_v27  ;;  %v1712_v34 = vld [vmem:[%s1621_s28 + $0x98] sm:$0xff]  ;;  %v1715_v35 = vld [vmem:[%s1621_s28 + $0x80] sm:$0xff]  ;;  %v1718_v36 = vld [vmem:[%s1621_s28 + $0x88] sm:$0xff] }
  0x3f   : > { %343 = vmax.xlane.f32.xlu1 %v342_v6  ;;  %279 = vadd.xlane.f32.xlu0 %v278_v7  ;;  %v302_v37 = vadd.f32 %v1712_v34, %v1709_v33  ;;  %v299_v38 = vadd.f32 %v1718_v36, %v1715_v35  ;;  %v366_v39 = vmax.f32 %v1709_v33, %v1712_v34  ;;  %v1729_v41 = vld [vmem:[%s1621_s28 + $0xb0] sm:$0xff]  ;;  %v1732_v42 = vld [vmem:[%s1621_s28 + $0xb8] sm:$0xff]  ;;  %v1735_v43 = vld [vmem:[%s1621_s28 + $0xa0] sm:$0xff]  ;;  %v1477_v7 = vmov 0  }
  0x40   : > { %v363_v40 = vmax.f32 %v1715_v35, %v1718_v36  ;;  %v1738_v44 = vld [vmem:[%s1621_s28 + $0xa8] sm:$0xff]  ;;  %v308_v45 = vadd.f32 %v1732_v42, %v1729_v41  ;;  %v372_v47 = vmax.f32 %v1729_v41, %v1732_v42  ;;  %v1749_v49 = vld [vmem:[%s1621_s28 + $0xd0] sm:$0xff]  ;;  %v1752_v50 = vld [vmem:[%s1621_s28 + $0xd8] sm:$0xff]  ;;  %1307 = vset.pattern.permute.xlu0 %v1477_v7  ;;  %1308 = vset.pattern.permute.xlu1 %v1477_v7 }
  0x41   : > { %v305_v46 = vadd.f32 %v1738_v44, %v1735_v43  ;;  %v369_v48 = vmax.f32 %v1735_v43, %v1738_v44  ;;  %v1755_v51 = vld [vmem:[%s1621_s28 + $0xc0] sm:$0xff]  ;;  %v1758_v52 = vld [vmem:[%s1621_s28 + $0xc8] sm:$0xff]  ;;  %v314_v53 = vadd.f32 %v1752_v50, %v1749_v49  ;;  %v378_v55 = vmax.f32 %v1749_v49, %v1752_v50  ;;  %v1769_v57 = vld [vmem:[%s1621_s28 + $0xf0] sm:$0xff] }
  0x42   : > { %v311_v54 = vadd.f32 %v1758_v52, %v1755_v51  ;;  %v375_v56 = vmax.f32 %v1755_v51, %v1758_v52  ;;  %v1772_v58 = vld [vmem:[%s1621_s28 + $0xf8] sm:$0xff]  ;;  %v1775_v59 = vld [vmem:[%s1621_s28 + $0xe0] sm:$0xff]  ;;  %v1778_v60 = vld [vmem:[%s1621_s28 + $0xe8] sm:$0xff]  ;;  %s1013_s28 = sshll.u32 %s1970_s26, 4  ;;  %s2033_s28 = int_to_ptr.vmem [resolvable:$true] %s1013_s28 }
  0x43   : > { %285 = vadd.xlane.f32.xlu1 %v284_v12  ;;  %282 = vadd.xlane.f32.xlu0 %v281_v13  ;;  %v320_v61 = vadd.f32 %v1772_v58, %v1769_v57  ;;  %v317_v62 = vadd.f32 %v1778_v60, %v1775_v59  ;;  %v384_v63 = vmax.f32 %v1769_v57, %v1772_v58  ;;  %v407_v6 = vld [vmem:[%s2085_s2] sm:$0xff]  ;;  %v510_v13 = vld [vmem:[%s2087_s4 + $0x50] sm:$0xff]  ;;  %s1403_s15 = scalar_lea.vmem %s2033_s28, 4096  ;;  %p1410_p8 = scmp.lt.s32.totalorder %s2033_s28, %s1408_s8 }
  0x44   : > { %v381_v3 = vmax.f32 %v1775_v59, %v1778_v60  ;;  %v508_v12 = vld [vmem:[%s2087_s4 + $0x40] sm:$0xff]  ;;  %p1404_p6 = scmp.ne.s32.totalorder %s2033_s28, %s1403_s15  ;;  %p1411_p10 = scmp.lt.s32.totalorder %s1409_s7, %s1403_s15 }
  0x46   : > { %p1405_p12 = pnand %p1404_p6, %p2095_p11  ;;  %p1412_p0 = por %p1411_p10, %p1410_p8 }
  0x47   : > { %349 = vmax.xlane.f32.xlu1 %v348_v14  ;;  %346 = vmax.xlane.f32.xlu0 %v345_v15  ;;  %v512_v14 = vld [vmem:[%s2087_s4 + $0x60] sm:$0xff]  ;;  %v514_v15 = vld [vmem:[%s2087_s4 + $0x70] sm:$0xff] }
  0x48   : > { %p1406_p13 = pneg %p1405_p12 }
  0x4a   : > { %p1413_p2 = pnand %p1412_p0, %p1406_p13 }
  0x4b   : > { %291 = vadd.xlane.f32.xlu1 %v290_v20  ;;  %288 = vadd.xlane.f32.xlu0 %v287_v21  ;;  %v387_v20 = vlaneseq }
  0x4f   : > { %355 = vmax.xlane.f32.xlu1 %v354_v22  ;;  %352 = vmax.xlane.f32.xlu0 %v351_v23  ;;  %v1803_v23 = vand.u32 127, %v387_v20 }
  0x51   : > { %vm389_vm1 = vcmp.eq.s32.totalorder %v1803_v23, 0  ;;  %v501_v23 = vld [vmem:[%s2087_s4 + $0x8] sm:$0xff] }
  0x53   : > { %297 = vadd.xlane.f32.xlu1 %v296_v28  ;;  %294 = vadd.xlane.f32.xlu0 %v293_v29 }
  0x57   : > { %361 = vmax.xlane.f32.xlu1 %v360_v31  ;;  %358 = vmax.xlane.f32.xlu0 %v357_v32 }
  0x5b   : > { %303 = vadd.xlane.f32.xlu1 %v302_v37  ;;  %300 = vadd.xlane.f32.xlu0 %v299_v38 }
  0x5f   : > { %367 = vmax.xlane.f32.xlu1 %v366_v39  ;;  %364 = vmax.xlane.f32.xlu0 %v363_v40 }
  0x63   : > { %309 = vadd.xlane.f32.xlu1 %v308_v45  ;;  %306 = vadd.xlane.f32.xlu0 %v305_v46 }
  0x67   : > { %373 = vmax.xlane.f32.xlu1 %v372_v47  ;;  %370 = vmax.xlane.f32.xlu0 %v369_v48 }
  0x6b   : > { %315 = vadd.xlane.f32.xlu1 %v314_v53  ;;  %312 = vadd.xlane.f32.xlu0 %v311_v54 }
  0x6f   : > { %379 = vmax.xlane.f32.xlu1 %v378_v55  ;;  %376 = vmax.xlane.f32.xlu0 %v375_v56 }
  0x73   : > { %321 = vadd.xlane.f32.xlu1 %v320_v61  ;;  %318 = vadd.xlane.f32.xlu0 %v317_v62 }
  0x77   : > { %385 = vmax.xlane.f32.xlu1 %v384_v63  ;;  %382 = vmax.xlane.f32.xlu0 %v381_v3 }
  0x8d   : > { %410 = vperm.xlu0 %1307, %v407_v6  }
  0x91   : > { %558 = vperm.xlu0 %1307, %v508_v12  }
  0x95   : > { %568 = vperm.xlu0 %1307, %v510_v13  }
  0x99   : > { %578 = vperm.xlu0 %1307, %v512_v14  }
  0x9d   : > { %588 = vperm.xlu0 %1307, %v514_v15  }
  0xc8   : > { %v341_v21 = vpop.xlane.xlu1 %340  ;;  %v277_v22 = vpop.xlane.xlu0 %276 }
  0xc9   : > { %v323_v28 = vmul.f32 0.00390625, %v277_v22 }
  0xcb   : > { %v390_v37 = vsel %vm389_vm1, %v323_v28, %v341_v21 }
  0xcc   : > { %v344_v29 = vpop.xlane.xlu1 %343  ;;  %v280_v31 = vpop.xlane.xlu0 %279 }
  0xcd   : > { %v324_v32 = vmul.f32 0.00390625, %v280_v31 }
  0xcf   : > { %v391_v38 = vsel %vm389_vm1, %v324_v32, %v344_v29 }
  0xd0   : > { %v286_v39 = vpop.xlane.xlu1 %285  ;;  %v283_v40 = vpop.xlane.xlu0 %282  ;;  %v1230_v45 = vpack.c.bf16 %v391_v38, %v390_v37 }
  0xd1   : > { %v326_v46 = vmul.f32 0.00390625, %v286_v39  ;;  %v325_v47 = vmul.f32 0.00390625, %v283_v40 }
  0xd2   : > { %1231 = vmatpush3.bf16.msra.mxu0 %v1230_v45 }
  0xd3   : > { %1232 = vmatprep.subr.bf16.mxu0 %v1474_v30 }
  0xd4   : > { %v350_v48 = vpop.xlane.xlu1 %349  ;;  %v347_v53 = vpop.xlane.xlu0 %346 }
  0xd5   : > { %v393_v54 = vsel %vm389_vm1, %v326_v46, %v350_v48  ;;  %v392_v55 = vsel %vm389_vm1, %v325_v47, %v347_v53 }
  0xd6   : > { %v1233_v56 = vpack.c.bf16 %v393_v54, %v392_v55 }
  0xd8   : > { %v292_v61 = vpop.xlane.xlu1 %291  ;;  %1234 = vmatpush3.bf16.msra.mxu0 %v1233_v56  ;;  %v289_v62 = vpop.xlane.xlu0 %288 }
  0xd9   : > { %1235 = vmatprep.subr.bf16.mxu0 %v1474_v30  ;;  %v328_v63 = vmul.f32 0.00390625, %v292_v61  ;;  %v327_v3 = vmul.f32 0.00390625, %v289_v62 }
  0xdc   : > { %v356_v4 = vpop.xlane.xlu1 %355  ;;  %v353_v6 = vpop.xlane.xlu0 %352 }
  0xdd   : > { %v395_v7 = vsel %vm389_vm1, %v328_v63, %v356_v4  ;;  %v394_v12 = vsel %vm389_vm1, %v327_v3, %v353_v6 }
  0xde   : > { %v1236_v13 = vpack.c.bf16 %v395_v7, %v394_v12 }
  0xe0   : > { %v298_v14 = vpop.xlane.xlu1 %297  ;;  %1237 = vmatpush3.bf16.msra.mxu0 %v1236_v13  ;;  %v295_v15 = vpop.xlane.xlu0 %294 }
  0xe1   : > { %1238 = vmatprep.subr.bf16.mxu0 %v1474_v30  ;;  %v330_v20 = vmul.f32 0.00390625, %v298_v14  ;;  %v329_v21 = vmul.f32 0.00390625, %v295_v15 }
  0xe4   : > { %v362_v22 = vpop.xlane.xlu1 %361  ;;  %v359_v28 = vpop.xlane.xlu0 %358 }
  0xe5   : > { %v397_v29 = vsel %vm389_vm1, %v330_v20, %v362_v22  ;;  %v396_v31 = vsel %vm389_vm1, %v329_v21, %v359_v28 }
  0xe6   : > { %v1239_v32 = vpack.c.bf16 %v397_v29, %v396_v31 }
  0xe8   : > { %v304_v37 = vpop.xlane.xlu1 %303  ;;  %1240 = vmatpush3.bf16.msra.mxu0 %v1239_v32  ;;  %v301_v38 = vpop.xlane.xlu0 %300 }
  0xe9   : > { %1241 = vmatprep.subr.bf16.mxu0 %v1474_v30  ;;  %v332_v39 = vmul.f32 0.00390625, %v304_v37  ;;  %v331_v40 = vmul.f32 0.00390625, %v301_v38 }
  0xec   : > { %v368_v45 = vpop.xlane.xlu1 %367  ;;  %v365_v46 = vpop.xlane.xlu0 %364 }
  0xed   : > { %v399_v47 = vsel %vm389_vm1, %v332_v39, %v368_v45  ;;  %v398_v48 = vsel %vm389_vm1, %v331_v40, %v365_v46 }
  0xee   : > { %v1242_v53 = vpack.c.bf16 %v399_v47, %v398_v48  ;;  %v406_v47 = vld [vmem:[%s2084_s1] sm:$0xff] }
  0xef   : > { %v500_v48 = vld [vmem:[%s2087_s4] sm:$0xff] }
  0xf0   : > { %v310_v54 = vpop.xlane.xlu1 %309  ;;  %1243 = vmatpush3.bf16.msra.mxu0 %v1242_v53  ;;  %v307_v55 = vpop.xlane.xlu0 %306  ;;  %518 = vperm.xlu1 %1308, %v500_v48   ;;  %v502_v53 = vld [vmem:[%s2087_s4 + $0x10] sm:$0xff] }
  0xf1   : > { %1244 = vmatprep.subr.bf16.mxu0 %v1474_v30  ;;  %v334_v56 = vmul.f32 0.00390625, %v310_v54  ;;  %v333_v61 = vmul.f32 0.00390625, %v307_v55  ;;  %v503_v54 = vld [vmem:[%s2087_s4 + $0x18] sm:$0xff]  ;;  %v504_v55 = vld [vmem:[%s2087_s4 + $0x20] sm:$0xff] }
  0xf4   : > { %v374_v62 = vpop.xlane.xlu1 %373  ;;  %v371_v63 = vpop.xlane.xlu0 %370  ;;  %523 = vperm.xlu1 %1308, %v501_v23  }
  0xf5   : > { %v401_v3 = vsel %vm389_vm1, %v334_v56, %v374_v62  ;;  %v400_v4 = vsel %vm389_vm1, %v333_v61, %v371_v63  ;;  %v505_v56 = vld [vmem:[%s2087_s4 + $0x28] sm:$0xff]  ;;  %v506_v61 = vld [vmem:[%s2087_s4 + $0x30] sm:$0xff]  ;;  %v507_v62 = vld [vmem:[%s2087_s4 + $0x38] sm:$0xff] }
  0xf6   : > { %v1245_v6 = vpack.c.bf16 %v401_v3, %v400_v4  ;;  %v509_v63 = vld [vmem:[%s2087_s4 + $0x48] sm:$0xff]  ;;  %v511_v3 = vld [vmem:[%s2087_s4 + $0x58] sm:$0xff] }
  0xf7   : > { %v513_v4 = vld [vmem:[%s2087_s4 + $0x68] sm:$0xff] }
  0xf8   : > { %v316_v7 = vpop.xlane.xlu1 %315  ;;  %1246 = vmatpush3.bf16.msra.mxu0 %v1245_v6  ;;  %v313_v12 = vpop.xlane.xlu0 %312  ;;  %528 = vperm.xlu1 %1308, %v502_v53   ;;  %v515_v6 = vld [vmem:[%s2087_s4 + $0x78] sm:$0xff] }
  0xf9   : > { %1247 = vmatprep.subr.bf16.mxu0 %v1474_v30  ;;  %v336_v13 = vmul.f32 0.00390625, %v316_v7  ;;  %v335_v14 = vmul.f32 0.00390625, %v313_v12 }
  0xfc   : > { %v380_v15 = vpop.xlane.xlu1 %379  ;;  %v377_v20 = vpop.xlane.xlu0 %376  ;;  %533 = vperm.xlu1 %1308, %v503_v54  }
  0xfd   : > { %v403_v21 = vsel %vm389_vm1, %v336_v13, %v380_v15  ;;  %v402_v22 = vsel %vm389_vm1, %v335_v14, %v377_v20  ;;  %v485_v20 = vld [vmem:[%s2086_s3 + $0x8] sm:$0xff] }
  0xfe   : > { %v1248_v28 = vpack.c.bf16 %v403_v21, %v402_v22  ;;  %v486_v21 = vld [vmem:[%s2086_s3 + $0x10] sm:$0xff]  ;;  %v487_v22 = vld [vmem:[%s2086_s3 + $0x18] sm:$0xff] }
 0x100   : > { %v322_v29 = vpop.xlane.xlu1 %321  ;;  %1249 = vmatpush3.bf16.msra.mxu0 %v1248_v28  ;;  %v319_v31 = vpop.xlane.xlu0 %318  ;;  %538 = vperm.xlu1 %1308, %v504_v55   ;;  %v488_v28 = vld [vmem:[%s2086_s3 + $0x20] sm:$0xff] }
 0x101   : > { %1250 = vmatprep.subr.bf16.mxu0 %v1474_v30  ;;  %v338_v32 = vmul.f32 0.00390625, %v322_v29  ;;  %v337_v37 = vmul.f32 0.00390625, %v319_v31  ;;  %v484_v30 = vld [vmem:[%s2086_s3] sm:$0xff]  ;;  %v489_v29 = vld [vmem:[%s2086_s3 + $0x28] sm:$0xff]  ;;  %v490_v31 = vld [vmem:[%s2086_s3 + $0x30] sm:$0xff] }
 0x102   : > { %1205 = vmatprep.mubr.msk.f32.mxu1 %vm596_vm2, %v484_v30  ;;  %v499_v30 = vld [vmem:[%s2086_s3 + $0x78] sm:$0xff] }
 0x104   : > { %v386_v38 = vpop.xlane.xlu1 %385  ;;  %v383_v39 = vpop.xlane.xlu0 %382  ;;  %543 = vperm.xlu1 %1308, %v505_v56  }
 0x105   : > { %v405_v40 = vsel %vm389_vm1, %v338_v32, %v386_v38  ;;  %v404_v45 = vsel %vm389_vm1, %v337_v37, %v383_v39  ;;  %v491_v32 = vld [vmem:[%s2086_s3 + $0x38] sm:$0xff]  ;;  %v492_v37 = vld [vmem:[%s2086_s3 + $0x40] sm:$0xff]  ;;  %v493_v38 = vld [vmem:[%s2086_s3 + $0x48] sm:$0xff] }
 0x106   : > { %v1251_v46 = vpack.c.bf16 %v405_v40, %v404_v45  ;;  %v494_v39 = vld [vmem:[%s2086_s3 + $0x50] sm:$0xff]  ;;  %v495_v40 = vld [vmem:[%s2086_s3 + $0x58] sm:$0xff]  ;;  %v496_v45 = vld [vmem:[%s2086_s3 + $0x60] sm:$0xff] }
 0x108   : > { %1252 = vmatpush3.bf16.msra.mxu0 %v1251_v46  ;;  %548 = vperm.xlu1 %1308, %v506_v61   ;;  %v497_v46 = vld [vmem:[%s2086_s3 + $0x68] sm:$0xff] }
 0x10b   : > { %1201 = vmatmul.mubr.f32.vlgmr.msra.gmra.mrb[0].mxu0 %v406_v47  ;;  %v498_v47 = vld [vmem:[%s2086_s3 + $0x70] sm:$0xff] }
 0x10c   : > { %553 = vperm.xlu1 %1308, %v507_v62   ;;  %v411_v7 = vpop.permute.xlu0 %410 }
 0x110   : > { %563 = vperm.xlu1 %1308, %v509_v63  }
 0x114   : > { %573 = vperm.xlu1 %1308, %v511_v3  }
 0x118   : > { %583 = vperm.xlu1 %1308, %v513_v4  }
 0x11c   : > { %593 = vperm.xlu1 %1308, %v515_v6  }
 0x16f   : > { %v519_v48 = vpop.permute.xlu1 %518 }
 0x173   : > { %v524_v23 = vpop.permute.xlu1 %523 }
 0x177   : > { %v529_v53 = vpop.permute.xlu1 %528 }
 0x17b   : > { %v534_v54 = vpop.permute.xlu1 %533 }
 0x17f   : > { %v539_v55 = vpop.permute.xlu1 %538 }
 0x183   : > { %v544_v56 = vpop.permute.xlu1 %543 }
 0x187   : > { %v549_v62 = vpop.permute.xlu1 %548 }
 0x1de   : > { %v479_v12 = vpop.f32.mrb[0].mxu0 }
 0x1df   : > { %v480_v13 = vadd.f32 %v479_v12, %v411_v7  ;;  %v1202_v14 = vpop.f32.mrb[1].mxu0 }
 0x1e1   : > { %v483_v15 = vmax.f32 %v480_v13, 0.0 }
 0x1e3   : > { %1203 = vmatprep.subr.mxu1 %v483_v15 }
 0x1e4   : > { %1204 = vmatpush3.msra.mxu1 %v483_v15  ;;  %v554_v15 = vpop.permute.xlu1 %553 }
 0x1e5   : > { %1206 = vmatmul.mubr.msk.f32.vlgmr.msra.gmra.mrb[0].mxu1 %vm596_vm2, %v485_v20 }
 0x1e6   : > { %1208 = vmatprep.mubr.msk.f32.mxu1 %vm596_vm2, %v486_v21 }
 0x1e9   : > { %1209 = vmatmul.mubr.msk.f32.gmra.mrb[2].mxu1 %vm596_vm2, %v487_v22 }
 0x1ea   : > { %1211 = vmatprep.mubr.msk.f32.mxu1 %vm596_vm2, %v488_v28 }
 0x1ed   : > { %1212 = vmatmul.mubr.msk.f32.gmra.mrb[4].mxu1 %vm596_vm2, %v489_v29 }
 0x1ee   : > { %1214 = vmatprep.mubr.msk.f32.mxu1 %vm596_vm2, %v490_v31  ;;  %v559_v31 = vpop.permute.xlu0 %558 }
 0x1f1   : > { %1215 = vmatmul.mubr.msk.f32.gmra.mrb[6].mxu1 %vm596_vm2, %v491_v32 }
 0x1f2   : > { %1217 = vmatprep.mubr.msk.f32.mxu1 %vm596_vm2, %v492_v37 }
 0x1f5   : > { %1218 = vmatmul.mubr.msk.f32.gmra.mrb[8].mxu1 %vm596_vm2, %v493_v38 }
 0x1f6   : > { %1220 = vmatprep.mubr.msk.f32.mxu1 %vm596_vm2, %v494_v39 }
 0x1f9   : > { %1221 = vmatmul.mubr.msk.f32.gmra.mrb[10].mxu1 %vm596_vm2, %v495_v40  ;;  %v564_v40 = vpop.permute.xlu1 %563 }
 0x1fa   : > { %1223 = vmatprep.mubr.msk.f32.mxu1 %vm596_vm2, %v496_v45 }
 0x1fd   : > { %1224 = vmatmul.mubr.msk.f32.gmra.mrb[12].mxu1 %vm596_vm2, %v497_v46 }
 0x1fe   : > { %1226 = vmatprep.mubr.msk.f32.mxu1 %vm596_vm2, %v498_v47 }
 0x201   : > { %1227 = vmatmul.mubr.msk.f32.gmra.mrb[14].mxu1 %vm596_vm2, %v499_v30 }
 0x2b8   : > { %v1207_v61 = vpop.f32.mrb[0].mxu1 }
 0x2b9   : > { %v717_v63 = vadd.f32 %v1207_v61, %v524_v23  ;;  %v711_v3 = vpop.f32.mrb[1].mxu1 }
 0x2ba   : > { %v712_v4 = vadd.f32 %v711_v3, %v519_v48 }
 0x2bb   : > { %v794_v6 = vsel %vm790_vm3, %v717_v63, 0.0 }
 0x2bc   : > { %795 = vadd.xlane.f32.xlu1 %v794_v6  ;;  %v1210_v7 = vpop.f32.mrb[2].mxu1  ;;  %v791_v12 = vsel %vm790_vm3, %v712_v4, 0.0 }
 0x2bd   : > { %v727_v13 = vadd.f32 %v1210_v7, %v534_v54  ;;  %v721_v14 = vpop.f32.mrb[3].mxu1  ;;  %792 = vadd.xlane.f32.xlu0 %v791_v12 }
 0x2be   : > { %v722_v21 = vadd.f32 %v721_v14, %v529_v53  ;;  %v569_v53 = vpop.permute.xlu0 %568 }
 0x2bf   : > { %v800_v20 = vsel %vm790_vm3, %v727_v13, 0.0 }
 0x2c0   : > { %v1213_v22 = vpop.f32.mrb[4].mxu1  ;;  %v797_v39 = vsel %vm790_vm3, %v722_v21, 0.0 }
 0x2c1   : > { %v731_v28 = vpop.f32.mrb[5].mxu1  ;;  %801 = vadd.xlane.f32.xlu0 %v800_v20  ;;  %v737_v32 = vadd.f32 %v1213_v22, %v544_v56  ;;  %v574_v56 = vpop.permute.xlu1 %573 }
 0x2c2   : > { %v732_v29 = vadd.f32 %v731_v28, %v539_v55  ;;  %v579_v7 = vpop.permute.xlu0 %578 }
 0x2c3   : > { %v806_v23 = vsel %vm790_vm3, %v737_v32, 0.0 }
 0x2c4   : > { %v1216_v37 = vpop.f32.mrb[6].mxu1  ;;  %v803_v38 = vsel %vm790_vm3, %v732_v29, 0.0 }
 0x2c5   : > { %v741_v45 = vpop.f32.mrb[7].mxu1  ;;  %804 = vadd.xlane.f32.xlu1 %v803_v38  ;;  %798 = vadd.xlane.f32.xlu0 %v797_v39  ;;  %v747_v47 = vadd.f32 %v1216_v37, %v554_v15  ;;  %v584_v20 = vpop.permute.xlu1 %583 }
 0x2c6   : > { %v742_v46 = vadd.f32 %v741_v45, %v549_v62  ;;  %v589_v37 = vpop.permute.xlu0 %588 }
 0x2c7   : > { %v812_v3 = vsel %vm790_vm3, %v747_v47, 0.0 }
 0x2c8   : > { %v1219_v30 = vpop.f32.mrb[8].mxu1  ;;  %v809_v48 = vsel %vm790_vm3, %v742_v46, 0.0 }
 0x2c9   : > { %v751_v54 = vpop.f32.mrb[9].mxu1  ;;  %810 = vadd.xlane.f32.xlu1 %v809_v48  ;;  %807 = vadd.xlane.f32.xlu0 %v806_v23  ;;  %v757_v61 = vadd.f32 %v1219_v30, %v564_v40  ;;  %v594_v40 = vpop.permute.xlu1 %593 }
 0x2ca   : > { %v752_v55 = vadd.f32 %v751_v54, %v559_v31 }
 0x2cb   : > { %v818_v14 = vsel %vm790_vm3, %v757_v61, 0.0 }
 0x2cc   : > { %v1222_v63 = vpop.f32.mrb[10].mxu1  ;;  %v815_v4 = vsel %vm790_vm3, %v752_v55, 0.0 }
 0x2cd   : > { %v761_v6 = vpop.f32.mrb[11].mxu1  ;;  %813 = vadd.xlane.f32.xlu0 %v812_v3  ;;  %816 = vadd.xlane.f32.xlu1 %v815_v4  ;;  %v767_v12 = vadd.f32 %v1222_v63, %v574_v56 }
 0x2ce   : > { %v762_v62 = vadd.f32 %v761_v6, %v569_v53 }
 0x2cf   : > { %v824_v31 = vsel %vm790_vm3, %v767_v12, 0.0 }
 0x2d0   : > { %v1225_v13 = vpop.f32.mrb[12].mxu1  ;;  %v821_v15 = vsel %vm790_vm3, %v762_v62, 0.0 }
 0x2d1   : > { %v771_v21 = vpop.f32.mrb[13].mxu1  ;;  %819 = vadd.xlane.f32.xlu0 %v818_v14  ;;  %822 = vadd.xlane.f32.xlu1 %v821_v15  ;;  %v777_v28 = vadd.f32 %v1225_v13, %v584_v20 }
 0x2d2   : > { %v772_v22 = vadd.f32 %v771_v21, %v579_v7 }
 0x2d3   : > { %v830_v46 = vsel %vm790_vm3, %v777_v28, 0.0 }
 0x2d4   : > { %v1228_v29 = vpop.f32.mrb[14].mxu1  ;;  %v827_v32 = vsel %vm790_vm3, %v772_v22, 0.0 }
 0x2d5   : > { %v781_v38 = vpop.f32.mrb[15].mxu1  ;;  %825 = vadd.xlane.f32.xlu0 %v824_v31  ;;  %828 = vadd.xlane.f32.xlu1 %v827_v32  ;;  %v787_v45 = vadd.f32 %v1228_v29, %v594_v40 }
 0x2d6   : > { %v782_v39 = vadd.f32 %v781_v38, %v589_v37 }
 0x2d7   : > { %v836_v30 = vsel %vm790_vm3, %v787_v45, 0.0 }
 0x2d8   : > { %v833_v47 = vsel %vm790_vm3, %v782_v39, 0.0 }
 0x2d9   : > { %831 = vadd.xlane.f32.xlu0 %v830_v46  ;;  %834 = vadd.xlane.f32.xlu1 %v833_v47 }
 0x2dd   : > { %837 = vadd.xlane.f32.xlu0 %v836_v30 }
 0x349   : > { %v796_v48 = vpop.xlane.xlu1 %795 }
 0x34a   : > { %v1112_v23 = vmul.f32 -1.442695, %v796_v48  ;;  %v793_v53 = vpop.xlane.xlu0 %792 }
 0x34b   : > { %v1111_v54 = vmul.f32 -1.442695, %v793_v53 }
 0x34c   : > { %1309 = vpow2.f32 %v1112_v23 }
 0x34d   : > { %1311 = vpow2.f32 %v1111_v54 }
 0x34e   : > { %v802_v55 = vpop.xlane.xlu0 %801 }
 0x34f   : > { %v1114_v56 = vmul.f32 -1.442695, %v802_v55 }
 0x351   : > { %1313 = vpow2.f32 %v1114_v56 }
 0x352   : > { %v805_v61 = vpop.xlane.xlu1 %804  ;;  %v799_v63 = vpop.xlane.xlu0 %798 }
 0x353   : > { %v1115_v3 = vmul.f32 -1.442695, %v805_v61  ;;  %v1113_v4 = vmul.f32 -1.442695, %v799_v63 }
 0x355   : > { %1315 = vpow2.f32 %v1115_v3 }
 0x356   : > { %v1310_v6 = vpop.eup %1309  ;;  %1317 = vpow2.f32 %v1113_v4  ;;  %v811_v62 = vpop.xlane.xlu1 %810 }
 0x357   : > { %v808_v7 = vpop.xlane.xlu0 %807  ;;  %v1312_v12 = vpop.eup %1311  ;;  %v888_v13 = vadd.f32 1.0, %v1310_v6  ;;  %v1117_v14 = vmul.f32 -1.442695, %v811_v62 }
 0x358   : > { %v887_v15 = vadd.f32 1.0, %v1312_v12  ;;  %v1116_v20 = vmul.f32 -1.442695, %v808_v7 }
 0x359   : > { %1319 = vrcp.f32 %v888_v13 }
 0x35a   : > { %1321 = vrcp.f32 %v887_v15  ;;  %v817_v21 = vpop.xlane.xlu1 %816 }
 0x35b   : > { %v814_v22 = vpop.xlane.xlu0 %813  ;;  %v1314_v28 = vpop.eup %1313  ;;  %1323 = vpow2.f32 %v1117_v14  ;;  %v1119_v29 = vmul.f32 -1.442695, %v817_v21 }
 0x35c   : > { %v1118_v31 = vmul.f32 -1.442695, %v814_v22  ;;  %v890_v32 = vadd.f32 1.0, %v1314_v28  ;;  %1325 = vpow2.f32 %v1116_v20 }
 0x35d   : > { %1327 = vpow2.f32 %v1119_v29 }
 0x35e   : > { %1329 = vrcp.f32 %v890_v32  ;;  %v823_v37 = vpop.xlane.xlu1 %822 }
 0x35f   : > { %v820_v38 = vpop.xlane.xlu0 %819  ;;  %v1316_v39 = vpop.eup %1315  ;;  %1331 = vpow2.f32 %v1118_v31  ;;  %v1121_v40 = vmul.f32 -1.442695, %v823_v37 }
 0x360   : > { %v1318_v45 = vpop.eup %1317  ;;  %v891_v46 = vadd.f32 1.0, %v1316_v39  ;;  %v1120_v47 = vmul.f32 -1.442695, %v820_v38 }
 0x361   : > { %v889_v30 = vadd.f32 1.0, %v1318_v45  ;;  %1333 = vpow2.f32 %v1121_v40 }
 0x362   : > { %1335 = vrcp.f32 %v891_v46  ;;  %v829_v48 = vpop.xlane.xlu1 %828 }
 0x363   : > { %v826_v23 = vpop.xlane.xlu0 %825  ;;  %v1320_v53 = vpop.eup %1319  ;;  %1337 = vrcp.f32 %v889_v30  ;;  %v1123_v54 = vmul.f32 -1.442695, %v829_v48 }
 0x364   : > { %v1122_v55 = vmul.f32 -1.442695, %v826_v23  ;;  %v1322_v56 = vpop.eup %1321  ;;  %v937_v61 = vmul.f32 %v1320_v53, %v1634_v2  ;;  %v938_v63 = vmul.f32 %v1320_v53, %v1641_v5  ;;  %1339 = vpow2.f32 %v1120_v47 }
 0x365   : > { %v1324_v3 = vpop.eup %1323  ;;  %v935_v4 = vmul.f32 %v1322_v56, %v1628_v0  ;;  %v936_v6 = vmul.f32 %v1322_v56, %v1631_v1  ;;  %1341 = vpow2.f32 %v1123_v54 }
 0x366   : > { %v1326_v62 = vpop.eup %1325  ;;  %969 = vst [vmem:[%s1970_s26 + $0x10] sm:$0xff] %v937_v61  ;;  %970 = vst [vmem:[%s1970_s26 + $0x18] sm:$0xff] %v938_v63  ;;  %v893_v2 = vadd.f32 1.0, %v1324_v3  ;;  %1343 = vpow2.f32 %v1122_v55  ;;  %v835_v5 = vpop.xlane.xlu1 %834 }
 0x367   : > { %v832_v7 = vpop.xlane.xlu0 %831  ;;  %v1328_v12 = vpop.eup %1327  ;;  %967 = vst [vmem:[%s1970_s26] sm:$0xff] %v935_v4  ;;  %968 = vst [vmem:[%s1970_s26 + $0x8] sm:$0xff] %v936_v6  ;;  %v892_v0 = vadd.f32 1.0, %v1326_v62  ;;  %v1125_v1 = vmul.f32 -1.442695, %v835_v5 }
 0x368   : > { %v1330_v13 = vpop.eup %1329  ;;  %1345 = vrcp.f32 %v893_v2  ;;  %v895_v14 = vadd.f32 1.0, %v1328_v12  ;;  %v1124_v22 = vmul.f32 -1.442695, %v832_v7 }
 0x369   : > { %v1332_v15 = vpop.eup %1331  ;;  %v941_v20 = vmul.f32 %v1330_v13, %v1648_v8  ;;  %v942_v21 = vmul.f32 %v1330_v13, %v1651_v9  ;;  %1347 = vrcp.f32 %v892_v0 }
 0x36a   : > { %1349 = vrcp.f32 %v895_v14  ;;  %v894_v28 = vadd.f32 1.0, %v1332_v15 }
 0x36b   : > { %v838_v29 = vpop.xlane.xlu0 %837  ;;  %v1334_v31 = vpop.eup %1333  ;;  %973 = vst [vmem:[%s1970_s26 + $0x30] sm:$0xff] %v941_v20  ;;  %974 = vst [vmem:[%s1970_s26 + $0x38] sm:$0xff] %v942_v21  ;;  %1351 = vpow2.f32 %v1125_v1 }
 0x36c   : > { %v1126_v32 = vmul.f32 -1.442695, %v838_v29  ;;  %v1336_v37 = vpop.eup %1335  ;;  %1353 = vrcp.f32 %v894_v28  ;;  %v897_v38 = vadd.f32 1.0, %v1334_v31 }
 0x36d   : > { %v1338_v8 = vpop.eup %1337  ;;  %v943_v9 = vmul.f32 %v1336_v37, %v1674_v18  ;;  %v944_v39 = vmul.f32 %v1336_v37, %v1677_v19  ;;  %1355 = vpow2.f32 %v1124_v22 }
 0x36e   : > { %v1340_v40 = vpop.eup %1339  ;;  %v939_v45 = vmul.f32 %v1338_v8, %v1654_v10  ;;  %v940_v46 = vmul.f32 %v1338_v8, %v1657_v11  ;;  %1357 = vrcp.f32 %v897_v38 }
 0x36f   : > { %v1342_v47 = vpop.eup %1341  ;;  %975 = vst [vmem:[%s1970_s26 + $0x40] sm:$0xff] %v943_v9  ;;  %976 = vst [vmem:[%s1970_s26 + $0x48] sm:$0xff] %v944_v39  ;;  %v896_v30 = vadd.f32 1.0, %v1340_v40  ;;  %1359 = vpow2.f32 %v1126_v32 }
 0x370   : > { %v1344_v48 = vpop.eup %1343  ;;  %971 = vst [vmem:[%s1970_s26 + $0x20] sm:$0xff] %v939_v45  ;;  %972 = vst [vmem:[%s1970_s26 + $0x28] sm:$0xff] %v940_v46  ;;  %v899_v18 = vadd.f32 1.0, %v1342_v47 }
 0x371   : > { %1361 = vrcp.f32 %v896_v30  ;;  %v898_v19 = vadd.f32 1.0, %v1344_v48 }
 0x372   : > { %v1346_v23 = vpop.eup %1345  ;;  %1363 = vrcp.f32 %v899_v18 }
 0x373   : > { %v1348_v10 = vpop.eup %1347  ;;  %v947_v11 = vmul.f32 %v1346_v23, %v1694_v26  ;;  %v948_v53 = vmul.f32 %v1346_v23, %v1697_v27  ;;  %1365 = vrcp.f32 %v898_v19 }
 0x374   : > { %v1350_v54 = vpop.eup %1349  ;;  %v945_v55 = vmul.f32 %v1348_v10, %v1668_v16  ;;  %v946_v56 = vmul.f32 %v1348_v10, %v1671_v17 }
 0x375   : > { %v1352_v61 = vpop.eup %1351  ;;  %979 = vst [vmem:[%s1970_s26 + $0x60] sm:$0xff] %v947_v11  ;;  %980 = vst [vmem:[%s1970_s26 + $0x68] sm:$0xff] %v948_v53  ;;  %v951_v63 = vmul.f32 %v1350_v54, %v1715_v35  ;;  %v952_v3 = vmul.f32 %v1350_v54, %v1718_v36 }
 0x376   : > { %v1354_v26 = vpop.eup %1353  ;;  %977 = vst [vmem:[%s1970_s26 + $0x50] sm:$0xff] %v945_v55  ;;  %978 = vst [vmem:[%s1970_s26 + $0x58] sm:$0xff] %v946_v56  ;;  %v901_v27 = vadd.f32 1.0, %v1352_v61 }
 0x377   : > { %v1356_v4 = vpop.eup %1355  ;;  %983 = vst [vmem:[%s1970_s26 + $0x80] sm:$0xff] %v951_v63  ;;  %984 = vst [vmem:[%s1970_s26 + $0x88] sm:$0xff] %v952_v3  ;;  %v949_v16 = vmul.f32 %v1354_v26, %v1688_v24  ;;  %v950_v17 = vmul.f32 %v1354_v26, %v1691_v25 }
 0x378   : > { %v1358_v6 = vpop.eup %1357  ;;  %1367 = vrcp.f32 %v901_v27  ;;  %v900_v62 = vadd.f32 1.0, %v1356_v4 }
 0x379   : > { %v1360_v35 = vpop.eup %1359  ;;  %981 = vst [vmem:[%s1970_s26 + $0x70] sm:$0xff] %v949_v16  ;;  %982 = vst [vmem:[%s1970_s26 + $0x78] sm:$0xff] %v950_v17  ;;  %v955_v36 = vmul.f32 %v1358_v6, %v1735_v43  ;;  %v956_v2 = vmul.f32 %v1358_v6, %v1738_v44 }
 0x37a   : > { %1369 = vrcp.f32 %v900_v62  ;;  %v902_v5 = vadd.f32 1.0, %v1360_v35 }
 0x37b   : > { %v1362_v7 = vpop.eup %1361  ;;  %987 = vst [vmem:[%s1970_s26 + $0xa0] sm:$0xff] %v955_v36  ;;  %988 = vst [vmem:[%s1970_s26 + $0xa8] sm:$0xff] %v956_v2 }
 0x37c   : > { %v1364_v24 = vpop.eup %1363  ;;  %v953_v25 = vmul.f32 %v1362_v7, %v1709_v33  ;;  %v954_v12 = vmul.f32 %v1362_v7, %v1712_v34  ;;  %1371 = vrcp.f32 %v902_v5 }
 0x37d   : > { %v1366_v43 = vpop.eup %1365  ;;  %v959_v44 = vmul.f32 %v1364_v24, %v1755_v51  ;;  %v960_v0 = vmul.f32 %v1364_v24, %v1758_v52 }
 0x37e   : > { %985 = vst [vmem:[%s1970_s26 + $0x90] sm:$0xff] %v953_v25  ;;  %986 = vst [vmem:[%s1970_s26 + $0x98] sm:$0xff] %v954_v12  ;;  %v957_v1 = vmul.f32 %v1366_v43, %v1729_v41  ;;  %v958_v13 = vmul.f32 %v1366_v43, %v1732_v42 }
 0x37f   : > { %991 = vst [vmem:[%s1970_s26 + $0xc0] sm:$0xff] %v959_v44  ;;  %992 = vst [vmem:[%s1970_s26 + $0xc8] sm:$0xff] %v960_v0 }
 0x380   : > { %989 = vst [vmem:[%s1970_s26 + $0xb0] sm:$0xff] %v957_v1  ;;  %990 = vst [vmem:[%s1970_s26 + $0xb8] sm:$0xff] %v958_v13 }
 0x382   : > { %v1368_v33 = vpop.eup %1367 }
 0x383   : > { %v963_v34 = vmul.f32 %v1368_v33, %v1775_v59  ;;  %v964_v51 = vmul.f32 %v1368_v33, %v1778_v60 }
 0x384   : > { %v1370_v52 = vpop.eup %1369 }
 0x385   : > { %995 = vst [vmem:[%s1970_s26 + $0xe0] sm:$0xff] %v963_v34  ;;  %996 = vst [vmem:[%s1970_s26 + $0xe8] sm:$0xff] %v964_v51  ;;  %v961_v41 = vmul.f32 %v1370_v52, %v1749_v49  ;;  %v962_v42 = vmul.f32 %v1370_v52, %v1752_v50 }
 0x386   : > { %v1372_v14 = vpop.eup %1371 }
 0x387   : > { %993 = vst [vmem:[%s1970_s26 + $0xd0] sm:$0xff] %v961_v41  ;;  %994 = vst [vmem:[%s1970_s26 + $0xd8] sm:$0xff] %v962_v42  ;;  %v965_v59 = vmul.f32 %v1372_v14, %v1769_v57  ;;  %v966_v60 = vmul.f32 %v1372_v14, %v1772_v58 }
 0x389   : > { %997 = vst [vmem:[%s1970_s26 + $0xf0] sm:$0xff] %v965_v59  ;;  %998 = vst [vmem:[%s1970_s26 + $0xf8] sm:$0xff] %v966_v60 }
 0x38a   : > { %1416 = shalt.err (!%p1413_p2)
}
 0x38b   : > { %s1417_s9 = scalar_lea.hbm %s2031_s14, 4096  ;;  %s1421_s13 = scalar_lea.hbm %s2088_s5, 8192 }
 0x38c   : > { %p1418_p4 = scmp.ne.s32.totalorder %s2031_s14, %s1417_s9  ;;  %p1422_p9 = scmp.lt.u32.totalorder %s2031_s14, %s2088_s5 }
 0x38d   : > { %p1423_p1 = scmp.lt.u32.totalorder %s1421_s13, %s1417_s9  ;;  %p1425_p6 = scmp.lt.u32.totalorder %s1417_s9, %s2031_s14 }
 0x38e   : > { %p1419_p5 = pnand %p1418_p4, %p2095_p11 }
 0x38f   : > { %p1424_p3 = por %p1423_p1, %p1422_p9 }
 0x390   : > { %p1420_p7 = pneg %p1419_p5 }
 0x391   : > { %p1426_p12 = por %p1425_p6, %p1424_p3 }
 0x393   : > { %p1427_p13 = pnand %p1426_p12, %p1420_p7 }
 0x395   : > { %1430 = shalt.err (!%p1427_p13)
}
 0x396   : > { %s1479_s25 = smov 256   ;;  %s1480_s29 = smov 16  }
 0x397   : > { %1255 = dma.vmem_to_hbm [thread:$0]  (%p2095_p11), %s2033_s28, 4096, %s2031_s14, %s1000_s22, %s1479_s25, %s1479_s25, %s1480_s29  }
 0x398 PF: > { %s1028_s12 = sand.u32 1, %s1457_s18   ;;  %p2096_p8 = scmp.ne.s32.totalorder %s2093_s6, 0 }
 0x399   : > { %p2097_p10 = scmp.ge.s32.totalorder %s1469_s21, 2  ;;  %s1029_s15 = scalar_lea.sflag [#allocation4], %s1028_s12 }
 0x39b   : > { %p1262_p0 = pnand %p2097_p10, %p2096_p8 }
 0x39d   : > { %1452 = dma.done.wait (!%p1262_p0), %s1029_s15, 4096  }
 0x39e   : > { %1454 = vsyncadd (!%p1262_p0), %s1029_s15, 4294963200  ;;  %p18_p2 = scmp.ge.s32.totalorder %s1536_s24, 4   ;;  %s2098_s18 = smov %s1461_s19 }
 0x39f   : > { %s2099_s19 = smov %s1465_s20  ;;  %s2100_s20 = smov %s1548_s27 }
 0x3a0   : > { %s2101_s21 = smov %s1536_s24  ;;  %20 = sbr.rel (!%p18_p2) target bundleno = 5 (0x5), region = 85 }
 0x3a7   :  { %1034 = vsyncpa [#allocation3], 1 }
 0x3a8   :  { %1036 = vsyncpa [#allocation3 + $0x1], 1 }
 0x3a9   :  { %1037 = vsyncpa [#allocation4], 1 }
 0x3aa   :  { %1039 = vsyncpa [#allocation4 + $0x1], 1 }

</bundles_post_ra>
